<compile_context>
chip_gen: v7x
topology: tpu7x:2x2x1
jax: 0.10.0
libtpu: 0.0.40
codegen_flags: <defaults>
</compile_context>

<pallas_src>
import math

import jax
import jax.numpy as jnp
from jax.experimental import pallas as pl
from jax.experimental.pallas import tpu as pltpu


def _pos_enc_kernel(x_ref, pe_ref, o_ref):
    # Flat path : x_ref/o_ref (TM, TN), pe_ref (1, TN)   -> broadcast add.
    # 3-D path  : x_ref/o_ref (1, TS, D), pe_ref (1, TS, D) -> plain add.
    # Dropout with p=0.0 is the identity, so the forward pass is just the add.
    o_ref[...] = x_ref[...] + pe_ref[...]


def _chip_budgets():
    """(target_bytes per x tile, vmem_limit cap) chosen per TPU generation."""
    try:
        kind = jax.devices()[0].device_kind.lower()
    except Exception:  # pragma: no cover - be robust to odd runtimes
        kind = ""
    if "v7" in kind:                       # 64 MiB physical VMEM, 3.2 TB/s HBM
        return 8 * 1024 * 1024, 48 * 1024 * 1024
    if "v6" in kind:                       # 128 MiB physical VMEM, 1.4 TB/s
        return 8 * 1024 * 1024, 64 * 1024 * 1024
    if "v5" in kind:                       # 128 MiB physical, 0.82 TB/s
        return 4 * 1024 * 1024, 48 * 1024 * 1024
    return 4 * 1024 * 1024, 48 * 1024 * 1024


def _choose_flat_tiles(rows, lanes, itemsize, sub, target_bytes):
    """Lane-dense tile (TM, TN) for the flattened (rows, lanes) layout:
       TN multiple of 128 (or the full lane extent),
       TM multiple of the packed sublane count `sub` (or the full row extent),
       sized at roughly `target_bytes` per x tile."""
    if lanes % 128 != 0 or lanes * itemsize * sub <= target_bytes:
        tn = lanes                                     # full lane extent
    else:
        tn_units = max(1, min(lanes // 128,
                              target_bytes // (sub * itemsize * 128)))
        tn = 128 * tn_units
    max_tm = max(1, target_bytes // (tn * itemsize))
    if rows <= max_tm:
        tm = rows                                      # full row extent
    else:
        tm = max(sub, (max_tm // sub) * sub)           # packed-sublane multiple
        tm = min(tm, rows)                             # full extent if rows < sub
    return tm, tn


def _choose_seq_tile(S, D, itemsize, sub, target_bytes):
    """Sequence-axis tile for the (B, S, D) fallback layout."""
    max_ts = max(1, target_bytes // (D * itemsize))
    if S <= max_ts:
        return S                                       # full extent
    ts = max(sub, (max_ts // sub) * sub)
    return min(ts, S)


def make_positional_encoding(d_model: int, max_len: int, dropout: float = 0.0,
                             target_bytes: int | None = None,
                             vmem_cap: int | None = None):
    """Builds the sinusoidal `pe` buffer exactly like the PyTorch __init__ and
    returns (forward, pe). Dropout is assumed 0.0 (identity)."""
    assert dropout == 0.0, "only p=0.0 (identity dropout) is implemented"
    assert d_model % 2 == 0, "d_model must be even (same constraint as the PyTorch pe build)"

    default_target, default_cap = _chip_budgets()
    target_bytes = default_target if target_bytes is None else target_bytes
    vmem_cap = default_cap if vmem_cap is None else vmem_cap

    position = jnp.arange(max_len, dtype=jnp.float32)[:, None]            # (max_len, 1)
    div_term = jnp.exp(
        jnp.arange(0, d_model, 2, dtype=jnp.float32) * (-math.log(10000.0) / d_model)
    )                                                                     # (d_model//2,)
    pe = jnp.zeros((1, max_len, d_model), dtype=jnp.float32)
    pe = pe.at[0, :, 0::2].set(jnp.sin(position * div_term))
    pe = pe.at[0, :, 1::2].set(jnp.cos(position * div_term))

    # Cache the sliced / cast / (optionally flattened) pe slab per (dtype, S, layout)
    # so steady-state calls add no extra XLA ops in the wrapper.
    _pe_cache = {}

    def _pe_slab(dtype, S, flat):
        key = (jnp.dtype(dtype).name, int(S), bool(flat))
        slab = _pe_cache.get(key)
        if slab is None:
            slab = pe[:, :S, :].astype(dtype)
            if flat:
                slab = slab.reshape(1, S * d_model)
            _pe_cache[key] = slab
        return slab

    def forward(x):
        B, S, D = x.shape
        assert D == d_model and S <= max_len

        itemsize = jnp.dtype(x.dtype).itemsize
        sub = max(8, 32 // itemsize)         # packed vreg sublane count (8/16/32)
        lanes = S * D

        # Use the lane-dense flat layout when the last dim tiles cleanly onto
        # 128 lanes OR a full-lane-extent tile comfortably fits the budget.
        use_flat = (lanes % 128 == 0) or (lanes * itemsize * sub <= target_bytes)

        if use_flat:
            x_flat = x.reshape(B, lanes)
            pe_flat = _pe_slab(x.dtype, S, flat=True)            # (1, lanes)

            tm, tn = _choose_flat_tiles(B, lanes, itemsize, sub, target_bytes)
            n_row = pl.cdiv(B, tm)
            n_lane = pl.cdiv(lanes, tn)

            tile_bytes = tm * tn * itemsize
            vmem_bytes = min(vmem_cap,
                             max(4 * 1024 * 1024,
                                 5 * tile_bytes + 2 * tn * itemsize))

            if n_lane == 1:
                # Collapse to 1-D so the (parallel) row axis can be sharded
                # across v7x's two TensorCores.
                grid = (n_row,)
                in_specs = [pl.BlockSpec((tm, tn), lambda i: (i, 0)),   # x rows
                            pl.BlockSpec((1, tn), lambda i: (0, 0))]    # pe (resident)
                out_spec = pl.BlockSpec((tm, tn), lambda i: (i, 0))
                dims = ("parallel",)
            else:
                # Lane-tile axis OUTER -> pe block index constant over the
                # inner row loop (pe fetched n_lane times, not n_lane * n_row).
                grid = (n_lane, n_row)
                in_specs = [pl.BlockSpec((tm, tn), lambda j, i: (i, j)),
                            pl.BlockSpec((1, tn), lambda j, i: (0, j))]
                out_spec = pl.BlockSpec((tm, tn), lambda j, i: (i, j))
                dims = ("parallel", "parallel")

            out_flat = pl.pallas_call(
                _pos_enc_kernel,
                out_shape=jax.ShapeDtypeStruct((B, lanes), x.dtype),
                grid_spec=pltpu.PrefetchScalarGridSpec(
                    num_scalar_prefetch=0,
                    grid=grid,
                    in_specs=in_specs,
                    out_specs=out_spec,
                ),
                compiler_params=pltpu.CompilerParams(
                    dimension_semantics=dims,
                    vmem_limit_bytes=vmem_bytes,
                ),
            )(x_flat, pe_flat)
            return out_flat.reshape(B, S, D)

        # ---- Fallback: (B, S, D) layout, tile the sequence axis -------------
        pe_slab = _pe_slab(x.dtype, S, flat=False)               # (1, S, D)
        ts = _choose_seq_tile(S, D, itemsize, sub, target_bytes)
        n_s = pl.cdiv(S, ts)

        tile_bytes = ts * D * itemsize
        vmem_bytes = min(vmem_cap,
                         max(4 * 1024 * 1024, 7 * tile_bytes))

        if n_s == 1:
            grid = (B,)
            in_specs = [pl.BlockSpec((1, ts, D), lambda b: (b, 0, 0)),
                        pl.BlockSpec((1, ts, D), lambda b: (0, 0, 0))]
            out_spec = pl.BlockSpec((1, ts, D), lambda b: (b, 0, 0))
            dims = ("parallel",)
        else:
            # Sequence-tile axis OUTER so the pe block stays resident across
            # the inner batch loop.
            grid = (n_s, B)
            in_specs = [pl.BlockSpec((1, ts, D), lambda si, b: (b, si, 0)),
                        pl.BlockSpec((1, ts, D), lambda si, b: (0, si, 0))]
            out_spec = pl.BlockSpec((1, ts, D), lambda si, b: (b, si, 0))
            dims = ("parallel", "parallel")

        return pl.pallas_call(
            _pos_enc_kernel,
            out_shape=jax.ShapeDtypeStruct((B, S, D), x.dtype),
            grid_spec=pltpu.PrefetchScalarGridSpec(
                num_scalar_prefetch=0,
                grid=grid,
                in_specs=in_specs,
                out_specs=out_spec,
            ),
            compiler_params=pltpu.CompilerParams(
                dimension_semantics=dims,
                vmem_limit_bytes=vmem_bytes,
            ),
        )(x, pe_slab)

    return forward, pe


if __name__ == "__main__":
    # Small shapes implied by the forward: (batch, seq, d_model)
    B, S, D = 2, 8, 32
    MAX_LEN = 16

    key = jax.random.PRNGKey(0)
    x_f32 = jax.random.normal(key, (B, S, D), dtype=jnp.float32)

    pos_enc, pe = make_positional_encoding(d_model=D, max_len=MAX_LEN, dropout=0.0)

    # float32 check (flat lane-dense path)
    out = jax.block_until_ready(pos_enc(x_f32))
    ref = x_f32 + pe[:, :S, :]
    assert out.shape == (B, S, D)
    assert jnp.allclose(out, ref, atol=1e-6), "f32 mismatch vs reference"

    # bfloat16 check (pe pre-cast once to bf16 and cached; reference built the same way)
    x_bf16 = x_f32.astype(jnp.bfloat16)
    out_bf16 = jax.block_until_ready(pos_enc(x_bf16))
    ref_bf16 = x_bf16 + pe[:, :S, :].astype(jnp.bfloat16)
    assert out_bf16.dtype == jnp.bfloat16
    assert jnp.allclose(out_bf16.astype(jnp.float32),
                        ref_bf16.astype(jnp.float32), atol=1e-2), "bf16 mismatch vs reference"

    # Exercise the 3-D fallback path: lanes % 128 != 0 and a tiny tile budget
    # forces sequence-axis tiling with a partial last block.
    B2, S2, D2, MAX2 = 2, 40, 24, 64
    x2 = jax.random.normal(jax.random.PRNGKey(1), (B2, S2, D2), dtype=jnp.float32)
    pos_enc2, pe2 = make_positional_encoding(d_model=D2, max_len=MAX2, dropout=0.0,
                                             target_bytes=2048,
                                             vmem_cap=4 * 1024 * 1024)
    out2 = jax.block_until_ready(pos_enc2(x2))
    ref2 = x2 + pe2[:, :S2, :]
    assert jnp.allclose(out2, ref2, atol=1e-6), "fallback-path mismatch vs reference"

    # TODO(synk): dropout with p > 0 (training mode) is not implemented; the
    # PyTorch module defaults to p=0.0 which is the identity.
    print("KERNEL_OK")
</pallas_src>

<mosaic_0001>
module attributes {stable_mosaic.version = 11 : i64} {
  func.func @_pos_enc_kernel(%arg0: i32, %arg1: memref<2x256xf32, #tpu.memory_space<vmem>>, %arg2: memref<1x256xf32, #tpu.memory_space<vmem>>, %arg3: memref<2x256xf32, #tpu.memory_space<vmem>>) attributes {dimension_semantics = [#tpu.dimension_semantics<parallel>], iteration_bounds = array<i64: 1>, scalar_prefetch = 0 : i64, scratch_operands = 0 : i64, tpu.core_type = #tpu.core_type<tc>, window_params = [{transform_indices = @transform_0, window_bounds = array<i64: 2, 256>}, {pipeline_mode = #tpu.pipeline_mode<synchronous>, transform_indices = @transform_1, window_bounds = array<i64: 1, 256>}, {transform_indices = @transform_2, window_bounds = array<i64: 2, 256>}]} {
    %c0 = arith.constant 0 : index
    %c0_0 = arith.constant 0 : index
    %0 = vector.load %arg1[%c0, %c0_0] : memref<2x256xf32, #tpu.memory_space<vmem>>, vector<2x256xf32>
    %c0_1 = arith.constant 0 : index
    %c0_2 = arith.constant 0 : index
    %1 = vector.load %arg2[%c0_1, %c0_2] : memref<1x256xf32, #tpu.memory_space<vmem>>, vector<1x256xf32>
    %2 = vector.broadcast %1 : vector<1x256xf32> to vector<2x256xf32>
    %3 = arith.addf %0, %2 : vector<2x256xf32>
    %c0_3 = arith.constant 0 : index
    %c0_4 = arith.constant 0 : index
    %4 = vector.load %arg3[%c0_3, %c0_4] : memref<2x256xf32, #tpu.memory_space<vmem>>, vector<2x256xf32>
    tpu.vector_store %arg3[%c0_3, %c0_4], %3 {strides = array<i32>} : memref<2x256xf32, #tpu.memory_space<vmem>>, vector<2x256xf32>,
    return
  }
  func.func @transform_0(%arg0: i32) -> (i32, i32) {
    %c0_i32 = arith.constant 0 : i32
    %c0_i32_0 = arith.constant 0 : i32
    return %arg0, %c0_i32 : i32, i32
  }
  func.func @transform_1(%arg0: i32) -> (i32, i32) {
    %c0_i32 = arith.constant 0 : i32
    %c0_i32_0 = arith.constant 0 : i32
    %c0_i32_1 = arith.constant 0 : i32
    return %c0_i32, %c0_i32_0 : i32, i32
  }
  func.func @transform_2(%arg0: i32) -> (i32, i32) {
    %c0_i32 = arith.constant 0 : i32
    %c0_i32_0 = arith.constant 0 : i32
    return %arg0, %c0_i32 : i32, i32
  }
}

</mosaic_0001>

<bundles_post_ra>
// kernel: tpu_custom_call.1
= control target key start
LH: loop header
LB: loop body
LE: loop exit
PB: predicated region body
PF: predicated region fallthrough
CT: control target
= control target key end

     0   :  { %7 = vsyncpa [#allocation3], 0  ;;  %s157_s0 = inlined_call_operand.hbm [shape: f32[2,256], index: 0, kind: input, shape index: {}]   ;;  %s158_s1 = inlined_call_operand.vmem [shape: f32[1,256], index: 1, kind: input, shape index: {}]   ;;  %s159_s2 = inlined_call_operand.hbm [shape: f32[2,256], index: 2, kind: output, shape index: {}]  }
   0x1   :  { %8 = vsyncpa [#allocation4], 0  ;;  %s112_s9 = smov [#allocation2]   ;;  %s64_s13 = scalar_lea.hbm %s157_s0, 64 }
   0x2   :  { %s15_s10 = sshll.u32 %s112_s9, 4  ;;  %p65_p0 = scmp.ne.s32.totalorder %s157_s0, %s64_s13  ;;  %s16_s10 = int_to_ptr.vmem [resolvable:$true] %s15_s10 }
   0x3   :  { %p68_p1 = scmp.lt.u32.totalorder %s64_s13, %s157_s0 }
   0x5   :  { %p70_p2 = pnand %p68_p1, %p65_p0 }
   0x7   :  { %73 = shalt.err (!%p70_p2)
}
   0x8   :  { %s74_s18 = scalar_lea.vmem %s16_s10, 64  ;;  %p79_p4 = scmp.lt.s32.totalorder %s16_s10, %s16_s10 }
   0x9   :  { %p75_p3 = scmp.ne.s32.totalorder %s16_s10, %s74_s18  ;;  %p80_p5 = scmp.lt.s32.totalorder %s74_s18, %s74_s18 }
   0xb   :  { %p81_p6 = por %p80_p5, %p79_p4 }
   0xd   :  { %p82_p7 = pnand %p81_p6, %p75_p3 }
   0xf   :  { %85 = shalt.err (!%p82_p7)
}
  0x10   :  { %18 = dma.hbm_to_vmem [thread:$0]  %s157_s0, 64, %s16_s10, [#allocation3]  }
  0x11   :  { %108 = dma.done.wait [#allocation3], 64  }
  0x12   :  { %109 = vsyncadd [#allocation3], 4294967232  ;;  %v27_v0 = vlaneseq  ;;  %v113_v1 = vmov 1983009808   ;;  %v25_v7 = vld [vmem:[%s158_s1] sm:$0x3] }
  0x13   :  { %v37_v2 = vunpack.c.l.s4 %v113_v1  ;;  %v24_v12 = vld [vmem:[#allocation2] sm:$0xf]  ;;  %s114_s23 = smov [#allocation5]  }
  0x14   :  { %v28_v3 = vshrl.u32 %v27_v0, 7  ;;  %s52_s0 = sshll.u32 %s114_s23, 4  ;;  %s53_s0 = int_to_ptr.vmem [resolvable:$true] %s52_s0 }
  0x15   :  { %v38_v6 = vunpack.c.0.s8 %v37_v2  ;;  %s86_s24 = scalar_lea.vmem %s53_s0, 64  ;;  %p91_p9 = scmp.lt.s32.totalorder %s53_s0, %s53_s0 }
  0x16   :  { %v29_v4 = vsub.s32 0, %v28_v3  ;;  %v33_v5 = vsub.s32 1, %v28_v3  ;;  %p87_p8 = scmp.ne.s32.totalorder %s53_s0, %s86_s24  ;;  %p92_p10 = scmp.lt.s32.totalorder %s86_s24, %s86_s24 }
  0x17   :  { %v41_v10 = vsub.s32 %v38_v6, %v28_v3 }
  0x18   :  { %v30_v8 = vrot.slane %v25_v7, %v29_v4  ;;  %v34_v9 = vrot.slane %v25_v7, %v33_v5  ;;  %p93_p11 = por %p92_p10, %p91_p9 }
  0x1a   :  { %v35_v11 = vcombine.low %v30_v8, %v34_v9  ;;  %p94_p12 = pnand %p93_p11, %p87_p8 }
  0x1c   :  { %v42_v13 = vrot.slane %v35_v11, %v41_v10 }
  0x1e   :  { %v44_v14 = vadd.f32 %v42_v13, %v24_v12 }
  0x20   :  { %45 = vst [vmem:[#allocation5] sm:$0xf] %v44_v14 }
  0x21   :  { %97 = shalt.err (!%p94_p12)
}
  0x22   :  { %s98_s26 = scalar_lea.hbm %s159_s2, 64 }
  0x23   :  { %p99_p13 = scmp.ne.s32.totalorder %s159_s2, %s98_s26  ;;  %p102_p0 = scmp.lt.u32.totalorder %s98_s26, %s159_s2 }
  0x25   :  { %p104_p1 = pnand %p102_p0, %p99_p13 }
  0x27   :  { %107 = shalt.err (!%p104_p1)
}
  0x28   :  { %55 = dma.vmem_to_hbm [thread:$0]  %s53_s0, 64, %s159_s2, [#allocation4]  }
  0x29   :  { %110 = dma.done.wait [#allocation4], 64  }
  0x2a   :  { %111 = vsyncadd [#allocation4], 4294967232 }
  0x2b   :  { %59 = vsyncpa [#allocation3], 1 }
  0x2c   :  { %60 = vsyncpa [#allocation4], 1 }

</bundles_post_ra>
